<compile_context>
chip_gen: v7x
topology: tpu7x:2x2x1
jax: 0.10.0
libtpu: 0.0.40
codegen_flags: <defaults>
</compile_context>

<pallas_src>
import functools

import jax
import jax.numpy as jnp
from jax import lax
from jax.experimental import pallas as pl
from jax.experimental.pallas import tpu as pltpu

NEG_SLOPE = 0.2
KERNEL = 3


def conv_block_kernel(x_ref, w_ref, b_ref, o_ref):
    # x_ref: (TM, 3*(W+2)*Cin)     bf16  -- im2row'd rows, kh folded into K
    # w_ref: (3*(W+2)*Cin, W*Cout) bf16  -- banded conv-as-matmul weights (resident)
    # b_ref: (1, W*Cout)           f32   -- bias tiled across W (resident)
    # o_ref: (TM, W*Cout)          f32 / bf16
    acc = jnp.dot(x_ref[...], w_ref[...], preferred_element_type=jnp.float32)
    acc = acc + b_ref[...]                            # bias add, f32
    acc = jnp.where(acc > 0, acc, NEG_SLOPE * acc)    # LeakyReLU(0.2), f32
    o_ref[...] = acc.astype(o_ref.dtype)


def _vmem_budget_bytes():
    """Generation-aware VMEM budget (leave headroom for compiler scratch)."""
    try:
        cap = int(pltpu.get_tpu_info().vmem_capacity_bytes)
    except Exception:
        cap = 64 << 20            # conservative: v7x per-TensorCore VMEM
    if cap <= (64 << 20):         # v7x-class (64 MiB / core)
        return 36 << 20
    return 96 << 20               # v5e / v6e (128 MiB)


def _pick_row_tile(m_rows, k, n_lanes, out_bytes, vmem_budget, max_rows=512):
    """Largest row tile (preferring multiples of 16, then 8) whose double-buffered
    tiles + resident banded weights fit the budget; keeps >=2 grid steps when
    possible so both v7x TensorCores get work."""
    resident = 2 * k * n_lanes * 2 + n_lanes * 4        # weights (worst-case 2 bufs) + bias
    tile_budget = max(vmem_budget // 2 - resident, 1 << 20)

    def fits(tm):
        return 2 * (tm * k * 2) + 2 * (tm * n_lanes * out_bytes) <= tile_budget

    cands = [t for t in range(1, min(m_rows, max_rows) + 1)
             if m_rows % t == 0 and fits(t)]
    if not cands:
        return 1
    pool = [t for t in cands if t % 16 == 0]
    if not pool:
        pool = [t for t in cands if t % 8 == 0]
    if not pool:
        pool = cands
    best = max(pool)
    if best == m_rows and m_rows >= 16:                 # keep >=2 parallel steps (v7x)
        smaller = [t for t in pool if t <= m_rows // 2]
        if smaller:
            best = max(smaller)
    return best


def _build_banded_weights(weight_oihw, W):
    """(Cout, Cin, 3, 3) -> (3*(W+2)*Cin, W*Cout) bf16 banded matmul weights.

    M[kh*(W+2)*Cin + (w+kw)*Cin + ci, w*Cout + co] = weight[co, ci, kh, kw]
    """
    w_hwio = jnp.transpose(weight_oihw, (2, 3, 1, 0)).astype(jnp.float32)  # (3,3,Cin,Cout)
    Cin, Cout = w_hwio.shape[2], w_hwio.shape[3]
    mats = []
    for kh in range(KERNEL):
        m = jnp.zeros(((W + 2) * Cin, W * Cout), jnp.float32)
        for kw in range(KERNEL):
            # Placement matrix P[w+kw, w] = 1 (shape (W+2, W)): folds the kw shift
            # onto the lane axis.
            P = jnp.zeros((W + 2, W), jnp.float32).at[
                jnp.arange(W) + kw, jnp.arange(W)].set(1.0)
            m = m + jnp.kron(P, w_hwio[kh, kw])         # ((W+2)*Cin, W*Cout)
        mats.append(m)
    return jnp.concatenate(mats, axis=0).astype(jnp.bfloat16)   # kh-major K axis


def _resident_spec(block_shape, index_map):
    """Constant-index operand: request a single VMEM buffer (no double buffering)."""
    try:
        return pl.BlockSpec(block_shape, index_map, pipeline_mode=pl.Buffered(1))
    except Exception:  # API without pipeline_mode -- plain (double-buffered) spec
        return pl.BlockSpec(block_shape, index_map)


@functools.partial(jax.jit, static_argnames=("row_tile", "vmem_limit", "out_dtype"))
def _conv_block_forward(x_nchw, weight_oihw, bias, *, row_tile, vmem_limit, out_dtype):
    N, Cin, H, W = x_nchw.shape
    Cout = weight_oihw.shape[0]
    WCin = (W + 2) * Cin
    K = KERNEL * WCin
    WCout = W * Cout
    M = N * H
    TM = row_tile
    assert M % TM == 0

    # ---- wrapper layout (XLA fuses transpose+cast, pad+slice+concat) ----
    x_nhwc = jnp.transpose(x_nchw, (0, 2, 3, 1)).astype(jnp.bfloat16)   # cast fused w/ transpose
    x_pad = jnp.pad(x_nhwc, ((0, 0), (1, 1), (1, 1), (0, 0)))           # (N, H+2, W+2, Cin)
    x_flat = x_pad.reshape(N, H + 2, WCin)
    # im2row along H: output row h reads padded rows h, h+1, h+2 (kh folded into K).
    # This trades ~3x activation reads for fully block-aligned kernel operands
    # (no halo slabs, no sublane-shifted in-kernel slices).
    x_rows = jnp.concatenate(
        [x_flat[:, kh:kh + H, :] for kh in range(KERNEL)], axis=-1)      # (N, H, 3*WCin)
    x_rows = x_rows.reshape(M, K)

    w_band = _build_banded_weights(weight_oihw, W)                       # (K, WCout) bf16
    b_row = jnp.tile(bias.astype(jnp.float32), W).reshape(1, WCout)      # (1, WCout) f32

    out_rows = pl.pallas_call(
        conv_block_kernel,
        out_shape=jax.ShapeDtypeStruct((M, WCout), out_dtype),
        grid=(M // TM,),
        in_specs=[
            pl.BlockSpec((TM, K), lambda i: (i, 0)),
            _resident_spec((K, WCout), lambda i: (0, 0)),
            _resident_spec((1, WCout), lambda i: (0, 0)),
        ],
        out_specs=pl.BlockSpec((TM, WCout), lambda i: (i, 0)),
        compiler_params=pltpu.CompilerParams(
            dimension_semantics=("parallel",),
            vmem_limit_bytes=vmem_limit),
    )(x_rows, w_band, b_row)

    # (N*H, W*Cout) -> (N, H, W, Cout) -> NCHW
    out_nhwc = out_rows.reshape(N, H, W, Cout)
    return jnp.transpose(out_nhwc, (0, 3, 1, 2))


def conv_block_forward(x_nchw, weight_oihw, bias, *, out_dtype=jnp.float32, row_tile=None):
    """Forward of ConvBlock(ndims=2, norm=False, act=True): conv3x3(s=1,p=1) + bias + LeakyReLU(0.2).

    x_nchw: (N, Cin, H, W) f32; weight: (Cout, Cin, 3, 3); bias: (Cout,)
    returns (N, Cout, H, W) in out_dtype (f32 default; bf16 halves write-back bytes).
    """
    N, Cin, H, W = x_nchw.shape
    Cout = int(weight_oihw.shape[0])
    K = KERNEL * (W + 2) * Cin
    WCout = W * Cout
    M = N * H
    out_bytes = jnp.dtype(out_dtype).itemsize

    budget = _vmem_budget_bytes()
    TM = _pick_row_tile(M, K, WCout, out_bytes, budget) if row_tile is None else int(row_tile)
    assert M % TM == 0, "row_tile must divide N*H"

    # Explicit VMEM request: resident weights/bias + double-buffered tiles, with headroom.
    est = (2 * K * WCout * 2 + WCout * 4
           + 2 * (TM * K * 2) + 2 * (TM * WCout * out_bytes))
    vmem_limit = int(min(budget, max(8 << 20, 2 * est)))

    return _conv_block_forward(x_nchw, weight_oihw, bias,
                               row_tile=int(TM), vmem_limit=vmem_limit, out_dtype=out_dtype)


def _reference(x_nchw, weight_oihw, bias):
    # Pure-JAX reference on bf16-rounded operands (matching the kernel's matmul
    # precision), f32 accumulation.
    xb = x_nchw.astype(jnp.bfloat16).astype(jnp.float32)
    wb = weight_oihw.astype(jnp.bfloat16).astype(jnp.float32)
    out = lax.conv_general_dilated(
        xb, wb, window_strides=(1, 1), padding=((1, 1), (1, 1)),
        dimension_numbers=('NCHW', 'OIHW', 'NCHW'))
    out = out + bias[None, :, None, None]
    return jnp.where(out > 0, out, NEG_SLOPE * out)


if __name__ == "__main__":
    key = jax.random.PRNGKey(0)
    k_x, k_w, k_b = jax.random.split(key, 3)

    # Shapes consistent with ConvBlock(ndims=2, in_channels=4, out_channels=8).
    N, Cin, Cout, H, W = 2, 4, 8, 16, 16

    x = jax.random.normal(k_x, (N, Cin, H, W), dtype=jnp.float32)

    # kaiming_normal_-style weights; module inits bias to 0 but we use a small
    # nonzero bias to exercise the bias path of the forward.
    fan_in = Cin * KERNEL * KERNEL
    weight = jax.random.normal(k_w, (Cout, Cin, KERNEL, KERNEL), dtype=jnp.float32) \
        * jnp.sqrt(2.0 / fan_in)
    bias = 0.1 * jax.random.normal(k_b, (Cout,), dtype=jnp.float32)

    # Auto row tile: M = N*H = 32 -> TM = 16 -> 2 parallel grid steps (both v7x TCs busy).
    out = conv_block_forward(x, weight, bias)
    out = jax.block_until_ready(out)

    ref = _reference(x, weight, bias)
    assert out.shape == (N, Cout, H, W)
    max_err = float(jnp.max(jnp.abs(out - ref)))
    assert jnp.allclose(out, ref, atol=2e-3, rtol=2e-3), \
        f"mismatch vs reference conv, max abs err {max_err}"

    print("KERNEL_OK")
</pallas_src>

<mosaic_0001>
module attributes {stable_mosaic.version = 11 : i64} {
  func.func @conv_block_kernel(%arg0: i32, %arg1: memref<16x216xbf16, #tpu.memory_space<vmem>>, %arg2: memref<216x128xbf16, #tpu.memory_space<vmem>>, %arg3: memref<1x128xf32, #tpu.memory_space<vmem>>, %arg4: memref<16x128xf32, #tpu.memory_space<vmem>>) attributes {dimension_semantics = [#tpu.dimension_semantics<parallel>], iteration_bounds = array<i64: 2>, scalar_prefetch = 0 : i64, scratch_operands = 0 : i64, tpu.core_type = #tpu.core_type<tc>, window_params = [{transform_indices = @transform_0, window_bounds = array<i64: 16, 216>}, {pipeline_mode = #tpu.pipeline_mode<synchronous>, transform_indices = @transform_1, window_bounds = array<i64: 216, 128>}, {pipeline_mode = #tpu.pipeline_mode<synchronous>, transform_indices = @transform_2, window_bounds = array<i64: 1, 128>}, {transform_indices = @transform_3, window_bounds = array<i64: 16, 128>}]} {
    %c0 = arith.constant 0 : index
    %c0_0 = arith.constant 0 : index
    %0 = vector.load %arg1[%c0, %c0_0] : memref<16x216xbf16, #tpu.memory_space<vmem>>, vector<16x216xbf16>
    %c0_1 = arith.constant 0 : index
    %c0_2 = arith.constant 0 : index
    %1 = vector.load %arg2[%c0_1, %c0_2] : memref<216x128xbf16, #tpu.memory_space<vmem>>, vector<216x128xbf16>
    %cst = arith.constant dense<0.000000e+00> : vector<16x128xf32>
    %2 = tpu.matmul %0, %1, %cst {dimension_numbers = #tpu.dot_dimension_numbers<[1], [0], [0], [1], [0, 0, 1, 1], [], []>} : vector<16x216xbf16>, vector<216x128xbf16>, vector<16x128xf32> -> vector<16x128xf32>
    %c0_3 = arith.constant 0 : index
    %c0_4 = arith.constant 0 : index
    %3 = vector.load %arg3[%c0_3, %c0_4] : memref<1x128xf32, #tpu.memory_space<vmem>>, vector<1x128xf32>
    %4 = vector.broadcast %3 : vector<1x128xf32> to vector<16x128xf32>
    %5 = arith.addf %2, %4 : vector<16x128xf32>
    %cst_5 = arith.constant 0.000000e+00 : f32
    %6 = vector.broadcast %cst_5 : f32 to vector<16x128xf32>
    %7 = arith.cmpf ogt, %5, %6 : vector<16x128xf32>
    %cst_6 = arith.constant 2.000000e-01 : f32
    %8 = vector.broadcast %cst_6 : f32 to vector<16x128xf32>
    %9 = arith.mulf %8, %5 : vector<16x128xf32>
    %10 = arith.select %7, %5, %9 : vector<16x128xi1>, vector<16x128xf32>
    %c0_7 = arith.constant 0 : index
    %c0_8 = arith.constant 0 : index
    %11 = vector.load %arg4[%c0_7, %c0_8] : memref<16x128xf32, #tpu.memory_space<vmem>>, vector<16x128xf32>
    tpu.vector_store %arg4[%c0_7, %c0_8], %10 {strides = array<i32>} : memref<16x128xf32, #tpu.memory_space<vmem>>, vector<16x128xf32>,
    return
  }
  func.func @transform_0(%arg0: i32) -> (i32, i32) {
    %c0_i32 = arith.constant 0 : i32
    %c0_i32_0 = arith.constant 0 : i32
    return %arg0, %c0_i32 : i32, i32
  }
  func.func @transform_1(%arg0: i32) -> (i32, i32) {
    %c0_i32 = arith.constant 0 : i32
    %c0_i32_0 = arith.constant 0 : i32
    %c0_i32_1 = arith.constant 0 : i32
    return %c0_i32, %c0_i32_0 : i32, i32
  }
  func.func @transform_2(%arg0: i32) -> (i32, i32) {
    %c0_i32 = arith.constant 0 : i32
    %c0_i32_0 = arith.constant 0 : i32
    %c0_i32_1 = arith.constant 0 : i32
    return %c0_i32, %c0_i32_0 : i32, i32
  }
  func.func @transform_3(%arg0: i32) -> (i32, i32) {
    %c0_i32 = arith.constant 0 : i32
    %c0_i32_0 = arith.constant 0 : i32
    return %arg0, %c0_i32 : i32, i32
  }
}

</mosaic_0001>

<bundles_post_ra>
// kernel: tile.8
= control target key start
LH: loop header
LB: loop body
LE: loop exit
PB: predicated region body
PF: predicated region fallthrough
CT: control target
= control target key end

     0   :  { %s28_s0 = inlined_call_operand.vmem [shape: f32[8], index: 0, kind: input, shape index: {}]   ;;  %s29_s1 = inlined_call_operand.vmem [shape: f32[16,8], index: 1, kind: output, shape index: {}]  }
   0x1   :  { %v4_v0 = vld [vmem:[%s28_s0] ss:$0 sm:$0xff] }
   0x2   :  { %5 = vst [vmem:[%s29_s1] sm:$0xff] %v4_v0  ;;  %8 = vst [vmem:[%s29_s1 + $0x8] sm:$0xff] %v4_v0 }

// kernel: tile.9
= control target key start
LH: loop header
LB: loop body
LE: loop exit
PB: predicated region body
PF: predicated region fallthrough
CT: control target
= control target key end

     0   :  { %s131_s10 = smov 120   ;;  %s132_s11 = smov 104   ;;  %vm3_vm0 = vcmask 64512   ;;  %vm9_vm1 = vcmask 1048512   ;;  %vm15_vm2 = vcmask 982912   ;;  %vm21_vm3 = vcmask 917312   ;;  %s207_s0 = inlined_call_operand.vmem [shape: f32[16,8], index: 0, kind: input, shape index: {}]   ;;  %s208_s1 = inlined_call_operand.vmem [shape: f32[1,128], index: 1, kind: output, shape index: {}]  }
   0x1   :  { %v101_v0 = vld [vmem:[%s207_s0 + $0xf] sm:$0x1]   ;;  %v103_v1 = vld [vmem:[%s207_s0 + $0xd] sm:$0x1]   ;;  %v102_v2 = vld [vmem:[%s207_s0 + $0xe] sm:$0x1]  }
   0x2   :  { %7 = vrot.lane.b32.xlu0 %v101_v0, %s131_s10  ;;  %19 = vrot.lane.b32.xlu1 %v103_v1, %s132_s11  ;;  %v104_v3 = vld [vmem:[%s207_s0 + $0xc] sm:$0x1]   ;;  %s133_s16 = smov 112   ;;  %s134_s17 = smov 96   ;;  %v105_v4 = vld [vmem:[%s207_s0 + $0xb] sm:$0x1]  }
   0x3   :  { %v106_v5 = vld [vmem:[%s207_s0 + $0xa] sm:$0x1]   ;;  %v2_v6 = vld [vmem:[%s207_s0] sm:$0x1]   ;;  %s135_s24 = smov 88   ;;  %s136_s25 = smov 80  }
   0x4   :  { %4 = vst.msk [vmem:[#allocation0] sm:$0x1] %vm3_vm0, %v2_v6   ;;  %v107_v7 = vld [vmem:[%s207_s0 + $0x9] sm:$0x1]   ;;  %v108_v8 = vld [vmem:[%s207_s0 + $0x8] sm:$0x1]  }
   0x5   :  { %s137_s30 = smov 72   ;;  %s138_s2 = smov 64   ;;  %v109_v9 = vld [vmem:[%s207_s0 + $0x7] sm:$0x1]   ;;  %v110_v10 = vld [vmem:[%s207_s0 + $0x6] sm:$0x1]  }
   0x6   :  { %13 = vrot.lane.b32.xlu0 %v102_v2, %s133_s16  ;;  %25 = vrot.lane.b32.xlu1 %v104_v3, %s134_s17  ;;  %s139_s7 = smov 56   ;;  %s140_s8 = smov 48   ;;  %v111_v11 = vld [vmem:[%s207_s0 + $0x5] sm:$0x1]   ;;  %v112_v12 = vld [vmem:[%s207_s0 + $0x4] sm:$0x1]  }
   0x7   :  { %s141_s13 = smov 40   ;;  %s142_s14 = smov 32   ;;  %v113_v13 = vld [vmem:[%s207_s0 + $0x3] sm:$0x1]   ;;  %v114_v14 = vld [vmem:[%s207_s0 + $0x2] sm:$0x1]  }
   0x8   :  { %s143_s19 = smov 24   ;;  %s144_s20 = smov 16   ;;  %v115_v15 = vld [vmem:[%s207_s0 + $0x1] sm:$0x1]   ;;  %vm27_vm4 = vcmask 851712   ;;  %vm33_vm5 = vcmask 786112  }
   0x9   :  { %s145_s0 = smov 8   ;;  %vm39_vm6 = vcmask 720512   ;;  %vm45_vm7 = vcmask 654912   ;;  %vm51_vm8 = vcmask 589312   ;;  %vm57_vm9 = vcmask 523712  }
   0xa   :  { %31 = vrot.lane.b32.xlu0 %v105_v4, %s135_s24  ;;  %37 = vrot.lane.b32.xlu1 %v106_v5, %s136_s25  ;;  %vm63_vm10 = vcmask 458112   ;;  %vm69_vm11 = vcmask 392512   ;;  %vm75_vm12 = vcmask 326912   ;;  %vm81_vm13 = vcmask 261312  }
   0xb   :  { %vm87_vm14 = vcmask 195712   ;;  %vm93_vm15 = vcmask 130112  }
   0xe   :  { %43 = vrot.lane.b32.xlu0 %v107_v7, %s137_s30  ;;  %49 = vrot.lane.b32.xlu1 %v108_v8, %s138_s2 }
  0x12   :  { %55 = vrot.lane.b32.xlu0 %v109_v9, %s139_s7  ;;  %61 = vrot.lane.b32.xlu1 %v110_v10, %s140_s8 }
  0x16   :  { %67 = vrot.lane.b32.xlu0 %v111_v11, %s141_s13  ;;  %73 = vrot.lane.b32.xlu1 %v112_v12, %s142_s14 }
  0x1a   :  { %79 = vrot.lane.b32.xlu0 %v113_v13, %s143_s19  ;;  %85 = vrot.lane.b32.xlu1 %v114_v14, %s144_s20 }
  0x1e   :  { %91 = vrot.lane.b32.xlu0 %v115_v15, %s145_s0 }
  0x74   :  { %v8_v16 = vpop.permute.xlu0 %7   ;;  %v20_v17 = vpop.permute.xlu1 %19  }
  0x75   :  { %10 = vst.msk [vmem:[#allocation0] sm:$0x1] %vm9_vm1, %v8_v16  }
  0x78   :  { %v14_v18 = vpop.permute.xlu0 %13   ;;  %v26_v19 = vpop.permute.xlu1 %25  }
  0x79   :  { %16 = vst.msk [vmem:[#allocation0] sm:$0x1] %vm15_vm2, %v14_v18  }
  0x7a   :  { %22 = vst.msk [vmem:[#allocation0] sm:$0x1] %vm21_vm3, %v20_v17  }
  0x7b   :  { %28 = vst.msk [vmem:[#allocation0] sm:$0x1] %vm27_vm4, %v26_v19  }
  0x7c   :  { %v32_v20 = vpop.permute.xlu0 %31   ;;  %v38_v21 = vpop.permute.xlu1 %37  }
  0x7d   :  { %34 = vst.msk [vmem:[#allocation0] sm:$0x1] %vm33_vm5, %v32_v20  }
  0x7e   :  { %40 = vst.msk [vmem:[#allocation0] sm:$0x1] %vm39_vm6, %v38_v21  }
  0x80   :  { %v44_v22 = vpop.permute.xlu0 %43   ;;  %v50_v23 = vpop.permute.xlu1 %49  }
  0x81   :  { %46 = vst.msk [vmem:[#allocation0] sm:$0x1] %vm45_vm7, %v44_v22  }
  0x82   :  { %52 = vst.msk [vmem:[#allocation0] sm:$0x1] %vm51_vm8, %v50_v23  }
  0x84   :  { %v56_v24 = vpop.permute.xlu0 %55   ;;  %v62_v25 = vpop.permute.xlu1 %61  }
  0x85   :  { %58 = vst.msk [vmem:[#allocation0] sm:$0x1] %vm57_vm9, %v56_v24  }
  0x86   :  { %64 = vst.msk [vmem:[#allocation0] sm:$0x1] %vm63_vm10, %v62_v25  }
  0x88   :  { %v68_v26 = vpop.permute.xlu0 %67   ;;  %v74_v27 = vpop.permute.xlu1 %73  }
  0x89   :  { %70 = vst.msk [vmem:[#allocation0] sm:$0x1] %vm69_vm11, %v68_v26  }
  0x8a   :  { %76 = vst.msk [vmem:[#allocation0] sm:$0x1] %vm75_vm12, %v74_v27  }
  0x8c   :  { %v80_v28 = vpop.permute.xlu0 %79   ;;  %v86_v29 = vpop.permute.xlu1 %85  }
  0x8d   :  { %82 = vst.msk [vmem:[#allocation0] sm:$0x1] %vm81_vm13, %v80_v28  }
  0x8e   :  { %88 = vst.msk [vmem:[#allocation0] sm:$0x1] %vm87_vm14, %v86_v29  }
  0x90   :  { %v92_v30 = vpop.permute.xlu0 %91  }
  0x91   :  { %94 = vst.msk [vmem:[#allocation0] sm:$0x1] %vm93_vm15, %v92_v30  }
  0x98   :  { %v98_v31 = vld [vmem:[#allocation0] sm:$0x1] }
  0x99   :  { %100 = vst [vmem:[%s208_s1] sm:$0x1] %v98_v31 }

// kernel: _conv_block_forward.1
= control target key start
LH: loop header
LB: loop body
LE: loop exit
PB: predicated region body
PF: predicated region fallthrough
CT: control target
= control target key end

     0   :  { %s503_s12 = smov 0   ;;  %s576_s0 = inlined_call_operand.vmem [shape: bf16[32,216], index: 0, kind: input, shape index: {}]   ;;  %s577_s1 = inlined_call_operand.vmem [shape: bf16[216,128], index: 1, kind: input, shape index: {}]   ;;  %s578_s2 = inlined_call_operand.vmem [shape: f32[1,128], index: 2, kind: input, shape index: {}]   ;;  %s579_s3 = inlined_call_operand.vmem [shape: f32[32,128], index: 3, kind: output, shape index: {}]  }
   0x1 LB: > { %s417_s13 = sadd.s32 4294967295, %s480_s12   ;;  %p421_p0 = scmp.ge.s32.totalorder %s480_s12, 1  ;;  %s480_s12 = sphi %s503_s12, %s13_s12  }
   0x2   : > { %p139_p1 = scmp.lt.s32.totalorder %s480_s12, 3 }
   0x4   : > { %p140_p2 = pnand %p421_p0, %p139_p1 }
   0x5   : > { %v457_v0 = vld [vmem:[%s577_s1] sm:$0xff] (!%p140_p2)   ;;  %v482_v1 = vmov (!%p140_p2), 0   ;;  %v458_v2 = vld [vmem:[%s577_s1 + $0x8] sm:$0xff] (!%p140_p2)   ;;  %s422_s18 = sshll.u32 (!%p140_p2), %s417_s13, 1  ;;  %v459_v3 = vld [vmem:[%s577_s1 + $0x10] sm:$0xff] (!%p140_p2)   ;;  %vm304_vm0 = vcmask (!%p140_p2), 719872  }
   0x6   : > { %143 = sbr.rel (%p140_p2) target bundleno = 282 (0x11a), region = 32  ;;  %312 = vmatprep.subr.bf16.mxu0 (!%p140_p2), %v482_v1  ;;  %p165_p3 = scmp.lt.s32.totalorder (!%p140_p2), %s422_s18, 3  ;;  %v460_v4 = vld [vmem:[%s577_s1 + $0x18] sm:$0xff] (!%p140_p2)   ;;  %v461_v5 = vld [vmem:[%s577_s1 + $0x20] sm:$0xff] (!%p140_p2)   ;;  %v462_v7 = vld [vmem:[%s577_s1 + $0x28] sm:$0xff] (!%p140_p2)   ;;  %vm308_vm1 = vcmask (!%p140_p2), 1043456  }
   0x7   : > { %313 = vmatpush1.bf16.msra.mxu0 (!%p140_p2), %v457_v0  ;;  %v463_v8 = vld [vmem:[%s577_s1 + $0x30] sm:$0xff] (!%p140_p2)   ;;  %v464_v9 = vld [vmem:[%s577_s1 + $0x38] sm:$0xff] (!%p140_p2)   ;;  %v465_v10 = vld [vmem:[%s577_s1 + $0x40] sm:$0xff] (!%p140_p2)  }
   0x8   : > { %314 = vmatprep.subr.bf16.mxu0 (!%p140_p2), %v482_v1  ;;  %v466_v11 = vld [vmem:[%s577_s1 + $0x48] sm:$0xff] (!%p140_p2)   ;;  %v467_v12 = vld [vmem:[%s577_s1 + $0x50] sm:$0xff] (!%p140_p2)   ;;  %v468_v13 = vld [vmem:[%s577_s1 + $0x58] sm:$0xff] (!%p140_p2)  }
   0x9   : > { %v469_v14 = vld [vmem:[%s577_s1 + $0x60] sm:$0xff] (!%p140_p2)   ;;  %v470_v15 = vld [vmem:[%s577_s1 + $0x68] ss:$0 sps:$4 sm:$0xff] (!%p140_p2)  }
   0xa   : > { %v310_v16 = vsel (!%p140_p2), %vm308_vm1, %v470_v15, 0  ;;  %v427_v18 = vld [vmem:[%s578_s2] ss:$0 sm:$0xff] (!%p140_p2) }
   0xb   : > { %315 = vmatpush1.bf16.msra.mxu0 (!%p140_p2), %v458_v2 }
   0xc   : > { %316 = vmatprep.subr.bf16.mxu0 (!%p140_p2), %v482_v1 }
   0xd   : > { %s581_s18 = smov (!%p165_p3, %s422_s18), 3 }
   0xe   : > { %s447_s21 = sshll.u32 %s581_s18, 3 }
   0xf   : > { %317 = vmatpush1.bf16.msra.mxu0 %v459_v3  ;;  %s531_s26 = scalar_lea.vmem %s576_s0, %s447_s21  ;;  %s175_s28 = scalar_lea.vmem %s579_s3, %s447_s21 }
  0x10   : > { %318 = vmatprep.subr.bf16.mxu0 %v482_v1  ;;  %v473_v6 = vld [vmem:[%s531_s26 + $0x4] ss:$8 sps:$4 sm:$0xff]   ;;  %v471_v17 = vld [vmem:[%s531_s26] ss:$8 sps:$4 sm:$0xff]  }
  0x11   : > { %444 = vmatprep.mubr.msk.bf16.mxu0 %vm304_vm0, %v473_v6 }
  0x13   : > { %319 = vmatpush1.bf16.msra.mxu0 %v460_v4 }
  0x14   : > { %320 = vmatprep.subr.bf16.mxu0 %v482_v1 }
  0x17   : > { %321 = vmatpush1.bf16.msra.mxu0 %v461_v5 }
  0x18   : > { %322 = vmatprep.subr.bf16.mxu0 %v482_v1 }
  0x1b   : > { %323 = vmatpush1.bf16.msra.mxu0 %v462_v7 }
  0x1c   : > { %324 = vmatprep.subr.bf16.mxu0 %v482_v1 }
  0x1f   : > { %325 = vmatpush1.bf16.msra.mxu0 %v463_v8 }
  0x20   : > { %326 = vmatprep.subr.bf16.mxu0 %v482_v1 }
  0x23   : > { %327 = vmatpush1.bf16.msra.mxu0 %v464_v9 }
  0x24   : > { %328 = vmatprep.subr.bf16.mxu0 %v482_v1 }
  0x27   : > { %329 = vmatpush1.bf16.msra.mxu0 %v465_v10 }
  0x28   : > { %330 = vmatprep.subr.bf16.mxu0 %v482_v1 }
  0x2b   : > { %331 = vmatpush1.bf16.msra.mxu0 %v466_v11 }
  0x2c   : > { %332 = vmatprep.subr.bf16.mxu0 %v482_v1 }
  0x2f   : > { %333 = vmatpush1.bf16.msra.mxu0 %v467_v12 }
  0x30   : > { %334 = vmatprep.subr.bf16.mxu0 %v482_v1 }
  0x33   : > { %335 = vmatpush1.bf16.msra.mxu0 %v468_v13 }
  0x34   : > { %336 = vmatprep.subr.bf16.mxu0 %v482_v1 }
  0x37   : > { %337 = vmatpush1.bf16.msra.mxu0 %v469_v14 }
  0x38   : > { %338 = vmatprep.subr.bf16.mxu0 %v482_v1 }
  0x3b   : > { %339 = vmatpush1.bf16.msra.mxu0 %v310_v16 }
  0x3e   : > { %345 = vmatmul.mubr.bf16.vlgmr.msra.gmra.mrb[0].mxu0 %v471_v17 }
 0x111   : > { %v346_v19 = vpop.f32.mrb[0].mxu0 }
 0x112   : > { %v347_v20 = vadd.f32 %v427_v18, %v346_v19  ;;  %v348_v21 = vpop.f32.mrb[1].mxu0 }
 0x113   : > { %v349_v22 = vpop.f32.mrb[2].mxu0 }
 0x114   : > { %vm353_vm2 = vcmp.gt.f32.partialorder %v347_v20, 0.0  ;;  %v355_v23 = vmul.f32 0.2, %v347_v20  ;;  %v350_v24 = vadd.f32 %v427_v18, %v349_v22  ;;  %v351_v25 = vpop.f32.mrb[3].mxu0 }
 0x116   : > { %v357_v26 = vsel %vm353_vm2, %v347_v20, %v355_v23  ;;  %vm354_vm3 = vcmp.gt.f32.partialorder %v350_v24, 0.0  ;;  %v356_v27 = vmul.f32 0.2, %v350_v24 }
 0x117   : > { %359 = vst [vmem:[%s175_s28] sm:$0xff] %v357_v26 }
 0x118   : > { %v358_v28 = vsel %vm354_vm3, %v350_v24, %v356_v27 }
 0x119   : > { %360 = vst [vmem:[%s175_s28 + $0x8] sm:$0xff] %v358_v28 }
 0x11a PF: > { %s13_s12 = sadd.s32 1, %s480_s12  }
 0x11b   : > { %p10_p4 = scmp.ge.s32.totalorder %s13_s12, 4  }
 0x11d   :  { %12 = sbr.rel (!%p10_p4) target bundleno = 1 (0x1), region = 62 }

</bundles_post_ra>
